<compile_context>
chip_gen: v6e
topology: v6e:2x2x1
jax: 0.10.0
libtpu: 0.0.40
codegen_flags: <defaults>
</compile_context>

<pallas_src>
import jax
import jax.numpy as jnp
from jax.experimental import pallas as pl
from jax.experimental.pallas import tpu as pltpu

K_IN = 784            # 28*28 flattened input; NOT explicitly padded — Mosaic
                      # lane-pads 784 -> 896 in the VMEM layout internally.
H1, H2 = 256, 128
H3 = 64
H3_PAD = 128          # layer-3 width padded to a full 128-lane tile
N_OUT = 10
N_OUT_PAD = 128       # lane-dense output slab; sliced back to 10 in wrapper

TB_CAP = 1024         # max batch tile (per-step VMEM ~10 MiB at f32 input)
VMEM_LIMIT = 32 * 1024 * 1024


def _round_up(n, m):
    return ((n + m - 1) // m) * m


def _mlp_kernel(x_ref,
                w1_ref, b1_ref,
                w2_ref, b2_ref,
                w3_ref, b3_ref,
                w4_ref, b4_ref,
                o_ref):
    # Cast the f32 input tile to bf16 in VMEM (no extra HBM pass in wrapper).
    x = x_ref[...].astype(jnp.bfloat16)

    # Layer 1: 784 -> 256, ReLU. bf16 MXU inputs, f32 accumulation.
    h = jnp.dot(x, w1_ref[...], preferred_element_type=jnp.float32) + b1_ref[...]
    h = jnp.maximum(h, 0.0)
    # Dropout(0.2): identity at inference.
    # TODO(synk): training-mode dropout (pltpu.prng_random_bits mask) not wired in.

    # Layer 2: 256 -> 128, ReLU.
    h = jnp.dot(h.astype(jnp.bfloat16), w2_ref[...],
                preferred_element_type=jnp.float32) + b2_ref[...]
    h = jnp.maximum(h, 0.0)

    # Layer 3: 128 -> 128 (zero-padded from 64), ReLU. Padded cols stay 0.
    h = jnp.dot(h.astype(jnp.bfloat16), w3_ref[...],
                preferred_element_type=jnp.float32) + b3_ref[...]
    h = jnp.maximum(h, 0.0)

    # Output layer: 128 -> 128 (zero-padded from 10), lane-dense bf16 store.
    o = jnp.dot(h.astype(jnp.bfloat16), w4_ref[...],
                preferred_element_type=jnp.float32) + b4_ref[...]
    o_ref[...] = o.astype(o_ref.dtype)


def prepare_params(params):
    """One-time weight prep: transpose PyTorch (out,in) -> (in,out), pad, bf16.

    Done once at parameter-load time so no transposes/pads/casts sit on the
    per-call path.
    """
    w1t = params["w1"].T                                     # (784, 256)
    w2t = params["w2"].T                                     # (256, 128)
    w3t = jnp.zeros((H2, H3_PAD), jnp.float32).at[:, :H3].set(params["w3"].T)
    w4t = jnp.zeros((H3_PAD, N_OUT_PAD), jnp.float32).at[:H3, :N_OUT].set(
        params["w4"].T)
    b3 = jnp.zeros((1, H3_PAD), jnp.float32).at[:, :H3].set(
        params["b3"].reshape(1, -1))
    b4 = jnp.zeros((1, N_OUT_PAD), jnp.float32).at[:, :N_OUT].set(
        params["b4"].reshape(1, -1))
    return {
        "w1t": w1t.astype(jnp.bfloat16),
        "w2t": w2t.astype(jnp.bfloat16),
        "w3t": w3t.astype(jnp.bfloat16),
        "w4t": w4t.astype(jnp.bfloat16),
        "b1": params["b1"].reshape(1, -1).astype(jnp.float32),
        "b2": params["b2"].reshape(1, -1).astype(jnp.float32),
        "b3": b3,
        "b4": b4,
    }


@jax.jit
def net_forward(x, prep):
    """x: (B, 1, 28, 28) float32.  prep: output of prepare_params()."""
    B = x.shape[0]
    # nn.Flatten: contiguous reshape only — fed straight to the kernel (f32).
    x_flat = x.reshape(B, -1)  # (B, 784)

    # Batch tile: multiple of 16 (bf16 sublane packing), big enough to
    # amortize the ~0.35us per-grid-step overhead, and chosen so the grid has
    # >= 2 steps whenever B allows so the "parallel" axis can shard across
    # v7x's two TensorCores.
    if B <= 16:
        TB = _round_up(max(B, 1), 16)
    else:
        TB = min(TB_CAP, _round_up(pl.cdiv(B, 2), 16))
    grid = (pl.cdiv(B, TB),)

    # Weights/biases: full-extent blocks with a constant index_map -> DMA'd
    # once and VMEM-resident across all batch steps; single-buffered because
    # they are never re-fetched (default double buffer is dead VMEM).
    def resident(a):
        idx = lambda i: (0,) * a.ndim
        try:
            return pl.BlockSpec(a.shape, idx, pipeline_mode=pl.Buffered(1))
        except (AttributeError, TypeError):
            return pl.BlockSpec(a.shape, idx)

    args = (x_flat,
            prep["w1t"], prep["b1"],
            prep["w2t"], prep["b2"],
            prep["w3t"], prep["b3"],
            prep["w4t"], prep["b4"])

    in_specs = [pl.BlockSpec((TB, K_IN), lambda i: (i, 0))]
    in_specs += [resident(a) for a in args[1:]]

    weight_bytes = sum(int(a.size) * a.dtype.itemsize for a in args[1:])
    flops = 2 * B * (K_IN * H1 + H1 * H2 + H2 * H3_PAD + H3_PAD * N_OUT_PAD)
    bytes_accessed = weight_bytes + B * K_IN * 4 + B * N_OUT_PAD * 2

    out = pl.pallas_call(
        _mlp_kernel,
        out_shape=jax.ShapeDtypeStruct((B, N_OUT_PAD), jnp.bfloat16),
        grid_spec=pltpu.PrefetchScalarGridSpec(
            num_scalar_prefetch=0,
            grid=grid,
            in_specs=in_specs,
            out_specs=pl.BlockSpec((TB, N_OUT_PAD), lambda i: (i, 0)),
        ),
        compiler_params=pltpu.CompilerParams(
            dimension_semantics=("parallel",),
            vmem_limit_bytes=VMEM_LIMIT),
        cost_estimate=pl.CostEstimate(
            flops=flops, transcendentals=0, bytes_accessed=bytes_accessed),
    )(*args)
    # Slice back to the 10 real logits; return f32 like the PyTorch module.
    return out[:, :N_OUT].astype(jnp.float32)


def init_params(key):
    """Deterministic init mimicking PyTorch Linear default (U(-k,k), k=1/sqrt(fan_in))."""
    dims = [(256, 784), (128, 256), (64, 128), (10, 64)]
    params = {}
    for i, (out_f, in_f) in enumerate(dims, start=1):
        key, kw, kb = jax.random.split(key, 3)
        bound = 1.0 / jnp.sqrt(in_f)
        params[f"w{i}"] = jax.random.uniform(
            kw, (out_f, in_f), jnp.float32, -bound, bound)
        params[f"b{i}"] = jax.random.uniform(
            kb, (out_f,), jnp.float32, -bound, bound)
    return params


def reference_forward(x, params):
    """Pure-JAX f32 reference (eval mode, dropout = identity)."""
    h = x.reshape(x.shape[0], -1)
    h = jnp.maximum(h @ params["w1"].T + params["b1"], 0.0)
    h = jnp.maximum(h @ params["w2"].T + params["b2"], 0.0)
    h = jnp.maximum(h @ params["w3"].T + params["b3"], 0.0)
    return h @ params["w4"].T + params["b4"]


if __name__ == "__main__":
    key = jax.random.PRNGKey(0)
    key, kx = jax.random.split(key)

    B = 32  # small batch; yields TB=16 and a 2-step "parallel" grid
    x = jax.random.normal(kx, (B, 1, 28, 28), jnp.float32)
    params = init_params(key)
    prep = prepare_params(params)   # one-time weight prep, off the call path

    out = net_forward(x, prep)
    out = jax.block_until_ready(out)

    ref = reference_forward(x, params)
    assert out.shape == (B, N_OUT), out.shape
    # bf16 MXU inputs (f32 accumulation) + bf16 logit store: ~1e-3..1e-2 abs err.
    max_err = float(jnp.max(jnp.abs(out - ref)))
    assert max_err < 5e-2, max_err

    print("KERNEL_OK")
</pallas_src>

<mosaic_0001>
module attributes {stable_mosaic.version = 11 : i64} {
  func.func @_mlp_kernel(%arg0: i32, %arg1: memref<16x784xf32, #tpu.memory_space<vmem>>, %arg2: memref<784x256xbf16, #tpu.memory_space<vmem>>, %arg3: memref<1x256xf32, #tpu.memory_space<vmem>>, %arg4: memref<256x128xbf16, #tpu.memory_space<vmem>>, %arg5: memref<1x128xf32, #tpu.memory_space<vmem>>, %arg6: memref<128x128xbf16, #tpu.memory_space<vmem>>, %arg7: memref<1x128xf32, #tpu.memory_space<vmem>>, %arg8: memref<128x128xbf16, #tpu.memory_space<vmem>>, %arg9: memref<1x128xf32, #tpu.memory_space<vmem>>, %arg10: memref<16x128xbf16, #tpu.memory_space<vmem>>) attributes {dimension_semantics = [#tpu.dimension_semantics<parallel>], iteration_bounds = array<i64: 2>, scalar_prefetch = 0 : i64, scratch_operands = 0 : i64, tpu.core_type = #tpu.core_type<tc>, window_params = [{transform_indices = @transform_0, window_bounds = array<i64: 16, 784>}, {pipeline_mode = #tpu.pipeline_mode<synchronous>, transform_indices = @transform_1, window_bounds = array<i64: 784, 256>}, {pipeline_mode = #tpu.pipeline_mode<synchronous>, transform_indices = @transform_2, window_bounds = array<i64: 1, 256>}, {pipeline_mode = #tpu.pipeline_mode<synchronous>, transform_indices = @transform_3, window_bounds = array<i64: 256, 128>}, {pipeline_mode = #tpu.pipeline_mode<synchronous>, transform_indices = @transform_4, window_bounds = array<i64: 1, 128>}, {pipeline_mode = #tpu.pipeline_mode<synchronous>, transform_indices = @transform_5, window_bounds = array<i64: 128, 128>}, {pipeline_mode = #tpu.pipeline_mode<synchronous>, transform_indices = @transform_6, window_bounds = array<i64: 1, 128>}, {pipeline_mode = #tpu.pipeline_mode<synchronous>, transform_indices = @transform_7, window_bounds = array<i64: 128, 128>}, {pipeline_mode = #tpu.pipeline_mode<synchronous>, transform_indices = @transform_8, window_bounds = array<i64: 1, 128>}, {transform_indices = @transform_9, window_bounds = array<i64: 16, 128>}]} {
    %c0 = arith.constant 0 : index
    %c0_0 = arith.constant 0 : index
    %0 = vector.load %arg1[%c0, %c0_0] : memref<16x784xf32, #tpu.memory_space<vmem>>, vector<16x784xf32>
    %1 = arith.truncf %0 : vector<16x784xf32> to vector<16x784xbf16>
    %c0_1 = arith.constant 0 : index
    %c0_2 = arith.constant 0 : index
    %2 = vector.load %arg2[%c0_1, %c0_2] : memref<784x256xbf16, #tpu.memory_space<vmem>>, vector<784x256xbf16>
    %cst = arith.constant dense<0.000000e+00> : vector<16x256xf32>
    %3 = tpu.matmul %1, %2, %cst {dimension_numbers = #tpu.dot_dimension_numbers<[1], [0], [0], [1], [0, 0, 1, 1], [], []>} : vector<16x784xbf16>, vector<784x256xbf16>, vector<16x256xf32> -> vector<16x256xf32>
    %c0_3 = arith.constant 0 : index
    %c0_4 = arith.constant 0 : index
    %4 = vector.load %arg3[%c0_3, %c0_4] : memref<1x256xf32, #tpu.memory_space<vmem>>, vector<1x256xf32>
    %5 = vector.broadcast %4 : vector<1x256xf32> to vector<16x256xf32>
    %6 = arith.addf %3, %5 : vector<16x256xf32>
    %cst_5 = arith.constant 0.000000e+00 : f32
    %7 = vector.broadcast %cst_5 : f32 to vector<16x256xf32>
    %8 = arith.maximumf %6, %7 : vector<16x256xf32>
    %9 = arith.truncf %8 : vector<16x256xf32> to vector<16x256xbf16>
    %c0_6 = arith.constant 0 : index
    %c0_7 = arith.constant 0 : index
    %10 = vector.load %arg4[%c0_6, %c0_7] : memref<256x128xbf16, #tpu.memory_space<vmem>>, vector<256x128xbf16>
    %cst_8 = arith.constant dense<0.000000e+00> : vector<16x128xf32>
    %11 = tpu.matmul %9, %10, %cst_8 {dimension_numbers = #tpu.dot_dimension_numbers<[1], [0], [0], [1], [0, 0, 1, 1], [], []>} : vector<16x256xbf16>, vector<256x128xbf16>, vector<16x128xf32> -> vector<16x128xf32>
    %c0_9 = arith.constant 0 : index
    %c0_10 = arith.constant 0 : index
    %12 = vector.load %arg5[%c0_9, %c0_10] : memref<1x128xf32, #tpu.memory_space<vmem>>, vector<1x128xf32>
    %13 = vector.broadcast %12 : vector<1x128xf32> to vector<16x128xf32>
    %14 = arith.addf %11, %13 : vector<16x128xf32>
    %cst_11 = arith.constant 0.000000e+00 : f32
    %15 = vector.broadcast %cst_11 : f32 to vector<16x128xf32>
    %16 = arith.maximumf %14, %15 : vector<16x128xf32>
    %17 = arith.truncf %16 : vector<16x128xf32> to vector<16x128xbf16>
    %c0_12 = arith.constant 0 : index
    %c0_13 = arith.constant 0 : index
    %18 = vector.load %arg6[%c0_12, %c0_13] : memref<128x128xbf16, #tpu.memory_space<vmem>>, vector<128x128xbf16>
    %cst_14 = arith.constant dense<0.000000e+00> : vector<16x128xf32>
    %19 = tpu.matmul %17, %18, %cst_14 {dimension_numbers = #tpu.dot_dimension_numbers<[1], [0], [0], [1], [0, 0, 1, 1], [], []>} : vector<16x128xbf16>, vector<128x128xbf16>, vector<16x128xf32> -> vector<16x128xf32>
    %c0_15 = arith.constant 0 : index
    %c0_16 = arith.constant 0 : index
    %20 = vector.load %arg7[%c0_15, %c0_16] : memref<1x128xf32, #tpu.memory_space<vmem>>, vector<1x128xf32>
    %21 = vector.broadcast %20 : vector<1x128xf32> to vector<16x128xf32>
    %22 = arith.addf %19, %21 : vector<16x128xf32>
    %cst_17 = arith.constant 0.000000e+00 : f32
    %23 = vector.broadcast %cst_17 : f32 to vector<16x128xf32>
    %24 = arith.maximumf %22, %23 : vector<16x128xf32>
    %25 = arith.truncf %24 : vector<16x128xf32> to vector<16x128xbf16>
    %c0_18 = arith.constant 0 : index
    %c0_19 = arith.constant 0 : index
    %26 = vector.load %arg8[%c0_18, %c0_19] : memref<128x128xbf16, #tpu.memory_space<vmem>>, vector<128x128xbf16>
    %cst_20 = arith.constant dense<0.000000e+00> : vector<16x128xf32>
    %27 = tpu.matmul %25, %26, %cst_20 {dimension_numbers = #tpu.dot_dimension_numbers<[1], [0], [0], [1], [0, 0, 1, 1], [], []>} : vector<16x128xbf16>, vector<128x128xbf16>, vector<16x128xf32> -> vector<16x128xf32>
    %c0_21 = arith.constant 0 : index
    %c0_22 = arith.constant 0 : index
    %28 = vector.load %arg9[%c0_21, %c0_22] : memref<1x128xf32, #tpu.memory_space<vmem>>, vector<1x128xf32>
    %29 = vector.broadcast %28 : vector<1x128xf32> to vector<16x128xf32>
    %30 = arith.addf %27, %29 : vector<16x128xf32>
    %31 = arith.truncf %30 : vector<16x128xf32> to vector<16x128xbf16>
    %c0_23 = arith.constant 0 : index
    %c0_24 = arith.constant 0 : index
    %32 = vector.load %arg10[%c0_23, %c0_24] : memref<16x128xbf16, #tpu.memory_space<vmem>>, vector<16x128xbf16>
    tpu.vector_store %arg10[%c0_23, %c0_24], %31 {strides = array<i32>} : memref<16x128xbf16, #tpu.memory_space<vmem>>, vector<16x128xbf16>,
    return
  }
  func.func @transform_0(%arg0: i32) -> (i32, i32) {
    %c0_i32 = arith.constant 0 : i32
    %c0_i32_0 = arith.constant 0 : i32
    return %arg0, %c0_i32 : i32, i32
  }
  func.func @transform_1(%arg0: i32) -> (i32, i32) {
    %c0_i32 = arith.constant 0 : i32
    %c0_i32_0 = arith.constant 0 : i32
    %c0_i32_1 = arith.constant 0 : i32
    return %c0_i32, %c0_i32_0 : i32, i32
  }
  func.func @transform_2(%arg0: i32) -> (i32, i32) {
    %c0_i32 = arith.constant 0 : i32
    %c0_i32_0 = arith.constant 0 : i32
    %c0_i32_1 = arith.constant 0 : i32
    return %c0_i32, %c0_i32_0 : i32, i32
  }
  func.func @transform_3(%arg0: i32) -> (i32, i32) {
    %c0_i32 = arith.constant 0 : i32
    %c0_i32_0 = arith.constant 0 : i32
    %c0_i32_1 = arith.constant 0 : i32
    return %c0_i32, %c0_i32_0 : i32, i32
  }
  func.func @transform_4(%arg0: i32) -> (i32, i32) {
    %c0_i32 = arith.constant 0 : i32
    %c0_i32_0 = arith.constant 0 : i32
    %c0_i32_1 = arith.constant 0 : i32
    return %c0_i32, %c0_i32_0 : i32, i32
  }
  func.func @transform_5(%arg0: i32) -> (i32, i32) {
    %c0_i32 = arith.constant 0 : i32
    %c0_i32_0 = arith.constant 0 : i32
    %c0_i32_1 = arith.constant 0 : i32
    return %c0_i32, %c0_i32_0 : i32, i32
  }
  func.func @transform_6(%arg0: i32) -> (i32, i32) {
    %c0_i32 = arith.constant 0 : i32
    %c0_i32_0 = arith.constant 0 : i32
    %c0_i32_1 = arith.constant 0 : i32
    return %c0_i32, %c0_i32_0 : i32, i32
  }
  func.func @transform_7(%arg0: i32) -> (i32, i32) {
    %c0_i32 = arith.constant 0 : i32
    %c0_i32_0 = arith.constant 0 : i32
    %c0_i32_1 = arith.constant 0 : i32
    return %c0_i32, %c0_i32_0 : i32, i32
  }
  func.func @transform_8(%arg0: i32) -> (i32, i32) {
    %c0_i32 = arith.constant 0 : i32
    %c0_i32_0 = arith.constant 0 : i32
    %c0_i32_1 = arith.constant 0 : i32
    return %c0_i32, %c0_i32_0 : i32, i32
  }
  func.func @transform_9(%arg0: i32) -> (i32, i32) {
    %c0_i32 = arith.constant 0 : i32
    %c0_i32_0 = arith.constant 0 : i32
    return %arg0, %c0_i32 : i32, i32
  }
}

</mosaic_0001>

<bundles_post_ra>
// kernel: net_forward.1
= control target key start
LH: loop header
LB: loop body
LE: loop exit
PB: predicated region body
PF: predicated region fallthrough
CT: control target
= control target key end

     0   :  { %14 = vsyncpa [#allocation3], 0  ;;  %s2176_s30 = smov 0   ;;  %s2634_s0 = inlined_call_operand.vmem [shape: f32[32,784], index: 0, kind: input, shape index: {}]   ;;  %s2635_s1 = inlined_call_operand.vmem [shape: bf16[784,256], index: 1, kind: input, shape index: {}]   ;;  %s2636_s2 = inlined_call_operand.vmem [shape: f32[1,256], index: 2, kind: input, shape index: {}]   ;;  %s2637_s3 = inlined_call_operand.vmem [shape: bf16[256,128], index: 3, kind: input, shape index: {}]   ;;  %s2638_s4 = inlined_call_operand.vmem [shape: f32[1,128], index: 4, kind: input, shape index: {}]   ;;  %s2639_s5 = inlined_call_operand.vmem [shape: bf16[128,128], index: 5, kind: input, shape index: {}]   ;;  %s2640_s6 = inlined_call_operand.vmem [shape: f32[1,128], index: 6, kind: input, shape index: {}]   ;;  %s2641_s7 = inlined_call_operand.hbm [shape: bf16[128,128], index: 7, kind: input, shape index: {}]   ;;  %s2642_s8 = inlined_call_operand.vmem [shape: f32[1,128], index: 8, kind: input, shape index: {}]   ;;  %s2643_s9 = inlined_call_operand.vmem [shape: bf16[32,128], index: 9, kind: output, shape index: {}]  }
   0x1 LB: > { %s1642_s10 = sadd.s32 4294967295, %s2118_s30   ;;  %p1644_p0 = scmp.ge.s32.totalorder %s2118_s30, 1  ;;  %s2118_s30 = sphi %s2176_s30, %s20_s30  }
   0x2   : > { %p245_p1 = scmp.lt.s32.totalorder %s2118_s30, 3  ;;  %s2120_s11 = smov [#allocation2]  }
   0x3   : > { %s275_s12 = sshll.u32 %s2120_s11, 4  ;;  %p2190_p3 = scmp.eq.s32.totalorder %s1642_s10, 0  ;;  %s276_s12 = int_to_ptr.vmem [resolvable:$true] %s275_s12 }
   0x4   : > { %p2184_p2 = pnand %p1644_p0, %p245_p1  ;;  %s2093_s15 = scalar_lea.vmem %s276_s12, 1024 }
   0x5   : > { %p2094_p7 = scmp.ne.s32.totalorder %s276_s12, %s2093_s15  ;;  %p2101_p10 = scmp.lt.s32.totalorder %s276_s12, %s276_s12 }
   0x6   : > { %p1883_p4 = pneg %p2184_p2  ;;  %p2102_p11 = scmp.lt.s32.totalorder %s2093_s15, %s2093_s15 }
   0x8   : > { %p1884_p5 = pnand %p2190_p3, %p1883_p4  ;;  %p2103_p12 = por %p2102_p11, %p2101_p10 }
   0xa   : > { %p2084_p6 = pneg %p1884_p5 }
   0xc   : > { %p2096_p8 = pnand %p2094_p7, %p2084_p6 }
   0xe   : > { %p2097_p9 = pneg %p2096_p8 }
  0x10   : > { %p2104_p13 = pnand %p2103_p12, %p2097_p9 }
  0x12   : > { %2107 = shalt.err (!%p2104_p13)
}
  0x13   : > { %s2121_s16 = smov 64   ;;  %s2122_s17 = smov 4  }
  0x14   : > { %1886 = dma.hbm_to_vmem [thread:$0]  (!%p1884_p5), %s2641_s7, 1024, %s276_s12, [#allocation3], %s2121_s16, %s2121_s16, %s2122_s17  }
  0x15   : > { %304 = sbr.rel (%p2184_p2) target bundleno = 976 (0x3d0), region = 56 }
  0x1a   : > { %2113 = dma.done.wait (%p2190_p3), [#allocation3], 1024  }
  0x1b   : > { %2115 = vsyncadd (%p2190_p3), [#allocation3], 4294966272  ;;  %v1903_v0 = vld [vmem:[%s2635_s1 + $0x74] ss:$8 sps:$4 sm:$0xff]   ;;  %v1905_v1 = vld [vmem:[%s2635_s1 + $0x70] ss:$8 sps:$4 sm:$0xff]  }
  0x1c   : > { %980 = vmatprep.subr.bf16.mxu0 %v1903_v0  ;;  %v1906_v2 = vld [vmem:[%s2635_s1 + $0x174] ss:$8 sps:$4 sm:$0xff]   ;;  %v1908_v3 = vld [vmem:[%s2635_s1 + $0x170] ss:$8 sps:$4 sm:$0xff]   ;;  %v1909_v4 = vld [vmem:[%s2635_s1 + $0x64] ss:$8 sps:$4 sm:$0xff]  }
  0x1d   : > { %981 = vmatpush1.bf16.msra.mxu0 %v1905_v1  ;;  %v1911_v5 = vld [vmem:[%s2635_s1 + $0x60] ss:$8 sps:$4 sm:$0xff]   ;;  %1023 = vmatprep.subr.bf16.mxu1 %v1906_v2  ;;  %v1912_v6 = vld [vmem:[%s2635_s1 + $0x164] ss:$8 sps:$4 sm:$0xff]   ;;  %v1915_v8 = vld [vmem:[%s2635_s1 + $0x54] ss:$8 sps:$4 sm:$0xff]  }
  0x1e   : > { %1024 = vmatpush1.bf16.msra.mxu1 %v1908_v3  ;;  %982 = vmatprep.subr.bf16.mxu0 %v1909_v4  ;;  %v1914_v7 = vld [vmem:[%s2635_s1 + $0x160] ss:$8 sps:$4 sm:$0xff]   ;;  %v1917_v9 = vld [vmem:[%s2635_s1 + $0x50] ss:$8 sps:$4 sm:$0xff]   ;;  %v1918_v10 = vld [vmem:[%s2635_s1 + $0x154] ss:$8 sps:$4 sm:$0xff]  }
  0x1f   : > { %1025 = vmatprep.subr.bf16.mxu1 %v1912_v6  ;;  %v1921_v11 = vld [vmem:[%s2635_s1 + $0x44] ss:$8 sps:$4 sm:$0xff]   ;;  %v1920_v12 = vld [vmem:[%s2635_s1 + $0x150] ss:$8 sps:$4 sm:$0xff]   ;;  %v1923_v14 = vld [vmem:[%s2635_s1 + $0x40] ss:$8 sps:$4 sm:$0xff]  }
  0x20   : > { %v1924_v13 = vld [vmem:[%s2635_s1 + $0x144] ss:$8 sps:$4 sm:$0xff]   ;;  %v1927_v15 = vld [vmem:[%s2635_s1 + $0x34] ss:$8 sps:$4 sm:$0xff]   ;;  %v1926_v16 = vld [vmem:[%s2635_s1 + $0x140] ss:$8 sps:$4 sm:$0xff]  }
  0x21   : > { %983 = vmatpush1.bf16.msra.mxu0 %v1911_v5  ;;  %v1930_v17 = vld [vmem:[%s2635_s1 + $0x134] ss:$8 sps:$4 sm:$0xff]   ;;  %v1929_v18 = vld [vmem:[%s2635_s1 + $0x30] ss:$8 sps:$4 sm:$0xff]   ;;  %v1933_v19 = vld [vmem:[%s2635_s1 + $0x24] ss:$8 sps:$4 sm:$0xff]  }
  0x22   : > { %984 = vmatprep.subr.bf16.mxu0 %v1915_v8  ;;  %1026 = vmatpush1.bf16.msra.mxu1 %v1914_v7  ;;  %v1932_v20 = vld [vmem:[%s2635_s1 + $0x130] ss:$8 sps:$4 sm:$0xff]   ;;  %v1936_v21 = vld [vmem:[%s2635_s1 + $0x124] ss:$8 sps:$4 sm:$0xff]   ;;  %v1935_v22 = vld [vmem:[%s2635_s1 + $0x20] ss:$8 sps:$4 sm:$0xff]  }
  0x23   : > { %1027 = vmatprep.subr.bf16.mxu1 %v1918_v10  ;;  %v1939_v23 = vld [vmem:[%s2635_s1 + $0x14] ss:$8 sps:$4 sm:$0xff]   ;;  %v1938_v24 = vld [vmem:[%s2635_s1 + $0x120] ss:$8 sps:$4 sm:$0xff]   ;;  %v1941_v26 = vld [vmem:[%s2635_s1 + $0x10] ss:$8 sps:$4 sm:$0xff]  }
  0x24   : > { %v1942_v25 = vld [vmem:[%s2635_s1 + $0x114] ss:$8 sps:$4 sm:$0xff]   ;;  %v1945_v27 = vld [vmem:[%s2635_s1 + $0x4] ss:$8 sps:$4 sm:$0xff]   ;;  %s1649_s19 = sshll.u32 %s1642_s10, 1  ;;  %vm976_vm0 = vcmask 130048  }
  0x25   : > { %985 = vmatpush1.bf16.msra.mxu0 %v1917_v9  ;;  %v1944_v28 = vld [vmem:[%s2635_s1 + $0x110] ss:$8 sps:$4 sm:$0xff]   ;;  %v1948_v29 = vld [vmem:[%s2635_s1 + $0x104] ss:$8 sps:$4 sm:$0xff]   ;;  %v1947_v30 = vld [vmem:[%s2635_s1] ss:$8 sps:$4 sm:$0xff]  }
  0x26   : > { %986 = vmatprep.subr.bf16.mxu0 %v1921_v11  ;;  %1028 = vmatpush1.bf16.msra.mxu1 %v1920_v12  ;;  %p342_p0 = scmp.lt.s32.totalorder %s1649_s19, 3  ;;  %v1951_v31 = vld [vmem:[%s2635_s1 + $0xf4] ss:$8 sps:$4 sm:$0xff]   ;;  %v1950_v32 = vld [vmem:[%s2635_s1 + $0x100] ss:$8 sps:$4 sm:$0xff]   ;;  %vm2125_vm1 = vmmov 0  }
  0x27   : > { %1029 = vmatprep.subr.bf16.mxu1 %v1924_v13  ;;  %v1954_v33 = vld [vmem:[%s2635_s1 + $0x1f4] ss:$8 sps:$4 sm:$0xff]   ;;  %v1953_v34 = vld [vmem:[%s2635_s1 + $0xf0] ss:$8 sps:$4 sm:$0xff]   ;;  %v1957_v35 = vld [vmem:[%s2635_s1 + $0xe4] ss:$8 sps:$4 sm:$0xff]  }
  0x28   : > { %s2647_s19 = smov (!%p342_p0, %s1649_s19), 3  ;;  %v1956_v36 = vld [vmem:[%s2635_s1 + $0x1f0] ss:$8 sps:$4 sm:$0xff]   ;;  %v1960_v37 = vld [vmem:[%s2635_s1 + $0x1e4] ss:$8 sps:$4 sm:$0xff]  }
  0x29   : > { %987 = vmatpush1.bf16.msra.mxu0 %v1923_v14  ;;  %v1959_v38 = vld [vmem:[%s2635_s1 + $0xe0] ss:$8 sps:$4 sm:$0xff]   ;;  %s1878_s23 = smul.u32 56, %s2647_s19  ;;  %v1963_v39 = vld [vmem:[%s2635_s1 + $0xd4] ss:$8 sps:$4 sm:$0xff]   ;;  %s1652_s16 = sshll.u32 %s2647_s19, 2 }
  0x2a   : > { %988 = vmatprep.subr.bf16.mxu0 %v1927_v15  ;;  %1030 = vmatpush1.bf16.msra.mxu1 %v1926_v16  ;;  %v1962_v40 = vld [vmem:[%s2635_s1 + $0x1e0] ss:$8 sps:$4 sm:$0xff]   ;;  %v1966_v41 = vld [vmem:[%s2635_s1 + $0x1d4] ss:$8 sps:$4 sm:$0xff]   ;;  %v1965_v42 = vld [vmem:[%s2635_s1 + $0xd0] ss:$8 sps:$4 sm:$0xff]   ;;  %s352_s20 = scalar_lea.vmem %s2643_s9, %s1652_s16 }
  0x2b   : > { %1031 = vmatprep.subr.bf16.mxu1 %v1930_v17  ;;  %s2344_s14 = scalar_lea.vmem %s2634_s0, %s1878_s23  ;;  %v1969_v43 = vld [vmem:[%s2635_s1 + $0xc4] ss:$8 sps:$4 sm:$0xff]   ;;  %v1968_v44 = vld [vmem:[%s2635_s1 + $0x1d0] ss:$8 sps:$4 sm:$0xff]   ;;  %v1971_v48 = vld [vmem:[%s2635_s1 + $0xc0] ss:$8 sps:$4 sm:$0xff]  }
  0x2c   : > { %v1972_v45 = vld [vmem:[%s2635_s1 + $0x1c4] ss:$8 sps:$4 sm:$0xff]   ;;  %v1975_v50 = vld [vmem:[%s2635_s1 + $0xb4] ss:$8 sps:$4 sm:$0xff]   ;;  %v1974_v51 = vld [vmem:[%s2635_s1 + $0x1c0] ss:$8 sps:$4 sm:$0xff]  }
  0x2d   : > { %989 = vmatpush1.bf16.msra.mxu0 %v1929_v18  ;;  %v356_v46 = vld [vmem:[%s2344_s14 + $0x8] sm:$0xff]  ;;  %v363_v47 = vld [vmem:[%s2344_s14 + $0x40] sm:$0xff]  ;;  %v358_v52 = vld [vmem:[%s2344_s14 + $0x18] sm:$0xff] }
  0x2e   : > { %990 = vmatprep.subr.bf16.mxu0 %v1933_v19  ;;  %1032 = vmatpush1.bf16.msra.mxu1 %v1932_v20  ;;  %v370_v49 = vpack.c.bf16 %v363_v47, %v356_v46  ;;  %v365_v53 = vld [vmem:[%s2344_s14 + $0x50] sm:$0xff]  ;;  %v1981_v57 = vld [vmem:[%s2635_s1 + $0xa4] ss:$8 sps:$4 sm:$0xff]   ;;  %v1983_v60 = vld [vmem:[%s2635_s1 + $0xa0] ss:$8 sps:$4 sm:$0xff]  }
  0x2f   : > { %1033 = vmatprep.subr.bf16.mxu1 %v1936_v21  ;;  %v1978_v54 = vld [vmem:[%s2635_s1 + $0x1b4] ss:$8 sps:$4 sm:$0xff]   ;;  %v372_v55 = vpack.c.bf16 %v365_v53, %v358_v52  ;;  %v1977_v56 = vld [vmem:[%s2635_s1 + $0xb0] ss:$8 sps:$4 sm:$0xff]   ;;  %v1984_v59 = vld [vmem:[%s2635_s1 + $0x1a4] ss:$8 sps:$4 sm:$0xff]  }
  0x30   : > { %1012 = vmatprep.mubr.bf16.mxu0 %v370_v49  ;;  %v1980_v58 = vld [vmem:[%s2635_s1 + $0x1b0] ss:$8 sps:$4 sm:$0xff]   ;;  %v1987_v61 = vld [vmem:[%s2635_s1 + $0x94] ss:$8 sps:$4 sm:$0xff]   ;;  %v1986_v62 = vld [vmem:[%s2635_s1 + $0x1a0] ss:$8 sps:$4 sm:$0xff]  }
  0x31   : > { %991 = vmatpush1.bf16.msra.mxu0 %v1935_v22  ;;  %1055 = vmatprep.mubr.bf16.mxu1 %v372_v55  ;;  %v1990_v63 = vld [vmem:[%s2635_s1 + $0x194] ss:$8 sps:$4 sm:$0xff]   ;;  %v1989_v0 = vld [vmem:[%s2635_s1 + $0x90] ss:$8 sps:$4 sm:$0xff]   ;;  %v1993_v2 = vld [vmem:[%s2635_s1 + $0x84] ss:$8 sps:$4 sm:$0xff]  }
  0x32   : > { %992 = vmatprep.subr.bf16.mxu0 %v1939_v23  ;;  %1034 = vmatpush1.bf16.msra.mxu1 %v1938_v24  ;;  %v1992_v1 = vld [vmem:[%s2635_s1 + $0x190] ss:$8 sps:$4 sm:$0xff]   ;;  %v1995_v3 = vld [vmem:[%s2635_s1 + $0x80] ss:$8 sps:$4 sm:$0xff]   ;;  %v1996_v4 = vld [vmem:[%s2635_s1 + $0x184] ss:$8 sps:$4 sm:$0xff]  }
  0x33   : > { %1035 = vmatprep.subr.bf16.mxu1 %v1942_v25  ;;  %v355_v5 = vld [vmem:[%s2344_s14] sm:$0xff]  ;;  %v362_v7 = vld [vmem:[%s2344_s14 + $0x38] sm:$0xff]  ;;  %v357_v9 = vld [vmem:[%s2344_s14 + $0x10] sm:$0xff]  ;;  %v2123_v21 = vmov 0  }
  0x34   : > { %v1998_v6 = vld [vmem:[%s2635_s1 + $0x180] ss:$8 sps:$4 sm:$0xff]   ;;  %v2001_v8 = vld [vmem:[%s2635_s1 + $0x274] ss:$8 sps:$4 sm:$0xff]   ;;  %v369_v11 = vpack.c.bf16 %v362_v7, %v355_v5  ;;  %v1999_v12 = vld [vmem:[%s2635_s1 + $0x270] ss:$8 sps:$4 sm:$0xff]  }
  0x35   : > { %993 = vmatpush1.bf16.msra.mxu0 %v1941_v26  ;;  %v364_v10 = vld [vmem:[%s2344_s14 + $0x48] sm:$0xff]  ;;  %v2007_v18 = vld [vmem:[%s2635_s1 + $0x254] ss:$8 sps:$4 sm:$0xff]   ;;  %v2005_v20 = vld [vmem:[%s2635_s1 + $0x250] ss:$8 sps:$4 sm:$0xff]  }
  0x36   : > { %994 = vmatprep.subr.bf16.mxu0 %v1945_v27  ;;  %1036 = vmatpush1.bf16.msra.mxu1 %v1944_v28  ;;  %v371_v13 = vpack.c.bf16 %v364_v10, %v357_v9  ;;  %v2004_v14 = vld [vmem:[%s2635_s1 + $0x264] ss:$8 sps:$4 sm:$0xff]   ;;  %v2044_v15 = vld [vmem:[%s2635_s1 + $0x300] ss:$8 sps:$4 sm:$0xff]   ;;  %v361_v22 = vld [vmem:[%s2344_s14 + $0x30] sm:$0xff]  ;;  %v476_v9 = vlaneseq }
  0x37   : > { %1037 = vmatprep.subr.bf16.mxu1 %v1948_v29  ;;  %v2046_v16 = vld [vmem:[%s2635_s1 + $0x304] ss:$8 sps:$4 sm:$0xff]   ;;  %v2002_v17 = vld [vmem:[%s2635_s1 + $0x260] ss:$8 sps:$4 sm:$0xff]   ;;  %v2013_v29 = vld [vmem:[%s2635_s1 + $0x234] ss:$8 sps:$4 sm:$0xff]  }
  0x38   : > { %v360_v19 = vld [vmem:[%s2344_s14 + $0x28] sm:$0xff]  ;;  %v367_v24 = vld [vmem:[%s2344_s14 + $0x60] sm:$0xff]  ;;  %v2035_v46 = vld [vmem:[%s2635_s1 + $0x2b0] ss:$8 sps:$4 sm:$0xff]  }
  0x39   : > { %995 = vmatpush1.bf16.msra.mxu0 %v1947_v30  ;;  %v368_v23 = vld [vmem:[%s2344_s14 + $0x68] sm:$0xff]  ;;  %v374_v26 = vpack.c.bf16 %v367_v24, %v360_v19  ;;  %v2011_v30 = vld [vmem:[%s2635_s1 + $0x230] ss:$8 sps:$4 sm:$0xff]   ;;  %v2043_v49 = vld [vmem:[%s2635_s1 + $0x294] ss:$8 sps:$4 sm:$0xff]  }
  0x3a   : > { %996 = vmatprep.subr.bf16.mxu0 %v1951_v31  ;;  %1038 = vmatpush1.bf16.msra.mxu1 %v1950_v32  ;;  %v2010_v25 = vld [vmem:[%s2635_s1 + $0x244] ss:$8 sps:$4 sm:$0xff]   ;;  %v375_v27 = vpack.c.bf16 %v368_v23, %v361_v22  ;;  %v2008_v28 = vld [vmem:[%s2635_s1 + $0x240] ss:$8 sps:$4 sm:$0xff]  }
  0x3b   : > { %1039 = vmatprep.subr.bf16.mxu1 %v1954_v33  ;;  %v2016_v31 = vld [vmem:[%s2635_s1 + $0x224] ss:$8 sps:$4 sm:$0xff]   ;;  %v2014_v32 = vld [vmem:[%s2635_s1 + $0x220] ss:$8 sps:$4 sm:$0xff]   ;;  %v2019_v33 = vld [vmem:[%s2635_s1 + $0x214] ss:$8 sps:$4 sm:$0xff]  }
  0x3c   : > { %v2040_v47 = vld [vmem:[%s2635_s1 + $0x2a4] ss:$8 sps:$4 sm:$0xff]   ;;  %v2047_v52 = vld [vmem:[%s2635_s1 + $0x280] ss:$8 sps:$4 sm:$0xff]  }
  0x3d   : > { %997 = vmatpush2.bf16.msra.mxu0 %v1953_v34  ;;  %v2017_v34 = vld [vmem:[%s2635_s1 + $0x210] ss:$8 sps:$4 sm:$0xff]   ;;  %v359_v53 = vld [vmem:[%s2344_s14 + $0x20] sm:$0xff]  ;;  %v2063_v5 = vld [vmem:[%s2637_s3 + $0x8] sm:$0xff]  }
  0x3e   : > { %998 = vmatprep.subr.bf16.mxu0 %v1957_v35  ;;  %1040 = vmatpush2.bf16.msra.mxu1 %v1956_v36  ;;  %v2022_v35 = vld [vmem:[%s2635_s1 + $0x204] ss:$8 sps:$4 sm:$0xff]   ;;  %v2020_v36 = vld [vmem:[%s2635_s1 + $0x200] ss:$8 sps:$4 sm:$0xff]  }
  0x3f   : > { %1041 = vmatprep.subr.bf16.mxu1 %v1960_v37  ;;  %v2025_v37 = vld [vmem:[%s2635_s1 + $0x2f4] ss:$8 sps:$4 sm:$0xff]   ;;  %v2065_v7 = vld [vmem:[%s2637_s3] sm:$0xff]  }
  0x41   : > { %999 = vmatpush2.bf16.msra.mxu0 %v1959_v38  ;;  %v2023_v38 = vld [vmem:[%s2635_s1 + $0x2f0] ss:$8 sps:$4 sm:$0xff]  }
  0x42   : > { %1000 = vmatprep.subr.bf16.mxu0 %v1963_v39  ;;  %1042 = vmatpush2.bf16.msra.mxu1 %v1962_v40  ;;  %v2028_v39 = vld [vmem:[%s2635_s1 + $0x2e4] ss:$8 sps:$4 sm:$0xff]   ;;  %v2026_v40 = vld [vmem:[%s2635_s1 + $0x2e0] ss:$8 sps:$4 sm:$0xff]  }
  0x43   : > { %1043 = vmatprep.subr.bf16.mxu1 %v1966_v41  ;;  %v2031_v41 = vld [vmem:[%s2635_s1 + $0x2d4] ss:$8 sps:$4 sm:$0xff]  }
  0x45   : > { %1001 = vmatpush2.bf16.msra.mxu0 %v1965_v42  ;;  %v2029_v42 = vld [vmem:[%s2635_s1 + $0x2d0] ss:$8 sps:$4 sm:$0xff]  }
  0x46   : > { %1002 = vmatprep.subr.bf16.mxu0 %v1969_v43  ;;  %1044 = vmatpush2.bf16.msra.mxu1 %v1968_v44  ;;  %v2034_v43 = vld [vmem:[%s2635_s1 + $0x2c4] ss:$8 sps:$4 sm:$0xff]   ;;  %v2032_v44 = vld [vmem:[%s2635_s1 + $0x2c0] ss:$8 sps:$4 sm:$0xff]  }
  0x47   : > { %1045 = vmatprep.subr.bf16.mxu1 %v1972_v45  ;;  %v2037_v45 = vld [vmem:[%s2635_s1 + $0x2b4] ss:$8 sps:$4 sm:$0xff]  }
  0x49   : > { %1003 = vmatpush2.bf16.msra.mxu0 %v1971_v48  ;;  %v2038_v48 = vld [vmem:[%s2635_s1 + $0x2a0] ss:$8 sps:$4 sm:$0xff]  }
  0x4a   : > { %1004 = vmatprep.subr.bf16.mxu0 %v1975_v50  ;;  %1046 = vmatpush2.bf16.msra.mxu1 %v1974_v51  ;;  %v2041_v50 = vld [vmem:[%s2635_s1 + $0x290] ss:$8 sps:$4 sm:$0xff]   ;;  %v2049_v51 = vld [vmem:[%s2635_s1 + $0x284] ss:$8 sps:$4 sm:$0xff]  }
  0x4b   : > { %1047 = vmatprep.subr.bf16.mxu1 %v1978_v54  ;;  %v366_v54 = vld [vmem:[%s2344_s14 + $0x58] sm:$0xff] }
  0x4c   : > { %v373_v55 = vpack.c.bf16 %v366_v54, %v359_v53  ;;  %v2066_v53 = vld [vmem:[%s2639_s5 + $0x38] sm:$0xff]  }
  0x4d   : > { %1005 = vmatpush2.bf16.msra.mxu0 %v1977_v56  ;;  %v2050_v56 = vld [vmem:[%s2637_s3 + $0x78] sm:$0xff]  }
  0x4e   : > { %1006 = vmatprep.subr.bf16.mxu0 %v1981_v57  ;;  %1048 = vmatpush2.bf16.msra.mxu1 %v1980_v58  ;;  %v2051_v57 = vld [vmem:[%s2637_s3 + $0x38] sm:$0xff]   ;;  %v2052_v58 = vld [vmem:[%s2637_s3 + $0x70] sm:$0xff]  }
  0x4f   : > { %1049 = vmatprep.subr.bf16.mxu1 %v1984_v59  ;;  %v2053_v59 = vld [vmem:[%s2637_s3 + $0x30] sm:$0xff]  }
  0x51   : > { %1007 = vmatpush2.bf16.msra.mxu0 %v1983_v60  ;;  %v2054_v60 = vld [vmem:[%s2637_s3 + $0x68] sm:$0xff]  }
  0x52   : > { %1008 = vmatprep.subr.bf16.mxu0 %v1987_v61  ;;  %1050 = vmatpush2.bf16.msra.mxu1 %v1986_v62  ;;  %v2055_v61 = vld [vmem:[%s2637_s3 + $0x28] sm:$0xff]   ;;  %v2056_v62 = vld [vmem:[%s2637_s3 + $0x60] sm:$0xff]  }
  0x53   : > { %1051 = vmatprep.subr.bf16.mxu1 %v1990_v63  ;;  %v2057_v63 = vld [vmem:[%s2637_s3 + $0x20] sm:$0xff]  }
  0x55   : > { %1009 = vmatpush2.bf16.msra.mxu0 %v1989_v0  ;;  %v2058_v0 = vld [vmem:[%s2637_s3 + $0x58] sm:$0xff]  }
  0x56   : > { %1010 = vmatprep.subr.bf16.mxu0 %v1993_v2  ;;  %1052 = vmatpush2.bf16.msra.mxu1 %v1992_v1  ;;  %v2059_v1 = vld [vmem:[%s2637_s3 + $0x18] sm:$0xff]   ;;  %v2060_v2 = vld [vmem:[%s2637_s3 + $0x50] sm:$0xff]  }
  0x57   : > { %1053 = vmatprep.subr.bf16.mxu1 %v1996_v4  ;;  %v2062_v4 = vld [vmem:[%s2637_s3 + $0x48] sm:$0xff]  }
  0x59   : > { %1011 = vmatpush2.bf16.msra.mxu0 %v1995_v3  ;;  %v2061_v3 = vld [vmem:[%s2637_s3 + $0x10] sm:$0xff]  }
  0x5a   : > { %1066 = vmatprep.subr.bf16.mxu0 %v2001_v8  ;;  %1054 = vmatpush2.bf16.msra.mxu1 %v1998_v6  ;;  %v2064_v6 = vld [vmem:[%s2637_s3 + $0x40] sm:$0xff]   ;;  %v2124_v8 = vmov 0.0  }
  0x5b   : > { %1123 = vmatprep.subr.bf16.mxu1 %v2046_v16 }
  0x5c   : > { %1013 = vmatmul.mubr.bf16.vlgmr.msra.gmra.mxu0 %v369_v11  ;;  %v477_v11 = vshrl.u32 %v476_v9, 7 }
  0x5d   : > { %1067 = vmatpush1.bf16.msra.mxu0 %v1999_v12  ;;  %1056 = vmatmul.mubr.bf16.vlgmr.msra.gmra.mxu1 %v371_v13 }
  0x5e   : > { %1068 = vmatprep.subr.bf16.mxu0 %v2004_v14  ;;  %1141 = vmatprep.mubr.bf16.mxu1 %v2123_v21  ;;  %v482_v14 = vsub.s32 1, %v477_v11  ;;  %v478_v16 = vsub.s32 0, %v477_v11 }
  0x5f   : > { %1124 = vmatpush1.bf16.msra.mxu1 %v2044_v15  ;;  %1098 = vmatprep.mubr.bf16.mxu0 %v374_v26  ;;  %v474_v15 = vld [vmem:[%s2636_s2] sm:$0x3] }
  0x60   : > { %1798 = vmatprep.subr.bf16.mxu1 %v2050_v56  ;;  %v483_v19 = vrot.slane %v474_v15, %v482_v14  ;;  %v2068_v56 = vld [vmem:[%s2639_s5 + $0x28] sm:$0xff]  }
  0x61   : > { %1069 = vmatpush1.bf16.msra.mxu0 %v2002_v17 }
  0x62   : > { %1070 = vmatprep.subr.bf16.mxu0 %v2007_v18 }
  0x65   : > { %1071 = vmatpush1.bf16.msra.mxu0 %v2005_v20  ;;  %1751 = vmatmul.mubr.msk.bf16.vlgmr.msra.gmra.mxu1 %vm976_vm0, %v375_v27  ;;  %v479_v20 = vrot.slane %v474_v15, %v478_v16  ;;  %v2079_v16 = vld [vmem:[#allocation2 + $0x10] sm:$0xff]  }
  0x66   : > { %1072 = vmatprep.subr.bf16.mxu0 %v2010_v25  ;;  %1799 = vmatpush3.bf16.msra.mxu1 %v2051_v57  ;;  %v2069_v57 = vld [vmem:[%s2639_s5 + $0x20] sm:$0xff]  }
  0x67   : > { %1800 = vmatprep.subr.bf16.mxu1 %v2052_v58  ;;  %v2070_v58 = vld [vmem:[%s2639_s5 + $0x18] sm:$0xff]  }
  0x69   : > { %1073 = vmatpush1.bf16.msra.mxu0 %v2008_v28 }
  0x6a   : > { %1074 = vmatprep.subr.bf16.mxu0 %v2013_v29  ;;  %1801 = vmatpush3.bf16.msra.mxu1 %v2053_v59  ;;  %v2071_v59 = vld [vmem:[%s2639_s5 + $0x10] sm:$0xff]  }
  0x6b   : > { %1802 = vmatprep.subr.bf16.mxu1 %v2054_v60  ;;  %v2072_v60 = vld [vmem:[%s2639_s5 + $0x8] sm:$0xff]  }
  0x6d   : > { %1075 = vmatpush1.bf16.msra.mxu0 %v2011_v30 }
  0x6e   : > { %1076 = vmatprep.subr.bf16.mxu0 %v2016_v31  ;;  %1803 = vmatpush3.bf16.msra.mxu1 %v2055_v61  ;;  %v2073_v61 = vld [vmem:[%s2639_s5] sm:$0xff]  }
  0x6f   : > { %1804 = vmatprep.subr.bf16.mxu1 %v2056_v62  ;;  %v2074_v62 = vld [vmem:[#allocation2 + $0x38] sm:$0xff]  }
  0x71   : > { %1077 = vmatpush1.bf16.msra.mxu0 %v2014_v32 }
  0x72   : > { %1078 = vmatprep.subr.bf16.mxu0 %v2019_v33  ;;  %1805 = vmatpush3.bf16.msra.mxu1 %v2057_v63  ;;  %v2075_v63 = vld [vmem:[#allocation2 + $0x30] sm:$0xff]  }
  0x73   : > { %1806 = vmatprep.subr.bf16.mxu1 %v2058_v0  ;;  %v2076_v0 = vld [vmem:[#allocation2 + $0x28] sm:$0xff]  }
  0x75   : > { %1079 = vmatpush1.bf16.msra.mxu0 %v2017_v34 }
  0x76   : > { %1080 = vmatprep.subr.bf16.mxu0 %v2022_v35  ;;  %1807 = vmatpush3.bf16.msra.mxu1 %v2059_v1  ;;  %v2077_v1 = vld [vmem:[#allocation2 + $0x20] sm:$0xff]  }
  0x77   : > { %1808 = vmatprep.subr.bf16.mxu1 %v2060_v2  ;;  %v2078_v2 = vld [vmem:[#allocation2 + $0x18] sm:$0xff]  }
  0x79   : > { %1081 = vmatpush1.bf16.msra.mxu0 %v2020_v36 }
  0x7a   : > { %1082 = vmatprep.subr.bf16.mxu0 %v2025_v37  ;;  %1809 = vmatpush3.bf16.msra.mxu1 %v2061_v3 }
  0x7b   : > { %1810 = vmatprep.subr.bf16.mxu1 %v2062_v4 }
  0x7d   : > { %1083 = vmatpush2.bf16.msra.mxu0 %v2023_v38 }
  0x7e   : > { %1084 = vmatprep.subr.bf16.mxu0 %v2028_v39  ;;  %1811 = vmatpush3.bf16.msra.mxu1 %v2063_v5 }
  0x7f   : > { %1812 = vmatprep.subr.bf16.mxu1 %v2064_v6  ;;  %v1752_v6 = vld [vmem:[%s2638_s4] ss:$0 sm:$0xff] }
  0x81   : > { %1085 = vmatpush2.bf16.msra.mxu0 %v2026_v40 }
  0x82   : > { %1086 = vmatprep.subr.bf16.mxu0 %v2031_v41  ;;  %1813 = vmatpush3.bf16.msra.mxu1 %v2065_v7 }
  0x83   : > { %1838 = vmatprep.subr.bf16.mxu1 %v2124_v8 }
  0x85   : > { %1087 = vmatpush2.bf16.msra.mxu0 %v2029_v42 }
  0x86   : > { %1088 = vmatprep.subr.bf16.mxu0 %v2034_v43 }
  0x89   : > { %1089 = vmatpush2.bf16.msra.mxu0 %v2032_v44 }
  0x8a   : > { %1090 = vmatprep.subr.bf16.mxu0 %v2037_v45 }
  0x8d   : > { %1091 = vmatpush2.bf16.msra.mxu0 %v2035_v46 }
  0x8e   : > { %1092 = vmatprep.subr.bf16.mxu0 %v2040_v47 }
  0x91   : > { %1093 = vmatpush2.bf16.msra.mxu0 %v2038_v48 }
  0x92   : > { %1094 = vmatprep.subr.bf16.mxu0 %v2043_v49 }
  0x95   : > { %1095 = vmatpush2.bf16.msra.mxu0 %v2041_v50 }
  0x96   : > { %1096 = vmatprep.subr.bf16.mxu0 %v2049_v51 }
  0x99   : > { %1097 = vmatpush2.bf16.msra.mxu0 %v2047_v52 }
  0x9a   : > { %1858 = vmatprep.subr.bf16.mxu0 %v2124_v8 }
  0x9c   : > { %1099 = vmatmul.mubr.bf16.vlgmr.msra.gmra.mxu0 %v373_v55  ;;  %v2067_v55 = vld [vmem:[%s2639_s5 + $0x30] sm:$0xff]  }
  0x9d   : > { %1874 = vmatprep.mubr.msk.bf16.mxu0 %vm2125_vm1, %v2124_v8  ;;  %1859 = vmatpush3.bf16.msra.mxu0 %v2074_v62 }
  0x9e   : > { %1860 = vmatprep.subr.bf16.mxu0 %v2124_v8 }
  0xa1   : > { %1861 = vmatpush3.bf16.msra.mxu0 %v2075_v63 }
  0xa2   : > { %1862 = vmatprep.subr.bf16.mxu0 %v2124_v8 }
  0xa5   : > { %1863 = vmatpush3.bf16.msra.mxu0 %v2076_v0 }
  0xa6   : > { %1864 = vmatprep.subr.bf16.mxu0 %v2124_v8 }
  0xa9   : > { %1865 = vmatpush3.bf16.msra.mxu0 %v2077_v1 }
  0xaa   : > { %1866 = vmatprep.subr.bf16.mxu0 %v2124_v8 }
  0xad   : > { %1867 = vmatpush3.bf16.msra.mxu0 %v2078_v2 }
  0xae   : > { %1868 = vmatprep.subr.bf16.mxu0 %v2124_v8 }
  0xb1   : > { %1869 = vmatpush3.bf16.msra.mxu0 %v2079_v16 }
  0xb2   : > { %1870 = vmatprep.subr.bf16.mxu0 %v2124_v8 }
 0x11c   : > { %v1014_v12 = vpop.f32.mrf.mxu0 }
 0x11d   : > { %v1057_v10 = vpop.f32.mrf.mxu1  ;;  %v1015_v25 = vadd.f32 %v1014_v12, %v479_v20 }
 0x11e   : > { %v1016_v17 = vpop.f32.mrf.mxu0 }
 0x11f   : > { %v1059_v13 = vpop.f32.mrf.mxu1  ;;  %v1017_v24 = vadd.f32 %v1016_v17, %v483_v19  ;;  %v1058_v32 = vadd.f32 %v1057_v10, %v1015_v25  ;;  %v2080_v17 = vld [vmem:[#allocation2 + $0x8] sm:$0xff]  }
 0x120   : > { %v1018_v21 = vpop.f32.mrf.mxu0  ;;  %1871 = vmatpush3.bf16.msra.mxu0 %v2080_v17 }
 0x121   : > { %v1061_v18 = vpop.f32.mrf.mxu1  ;;  %v1019_v27 = vadd.f32 %v1018_v21, %v479_v20  ;;  %v1060_v30 = vadd.f32 %v1059_v13, %v1017_v24  ;;  %1872 = vmatprep.subr.bf16.mxu0 %v2124_v8 }
 0x122   : > { %v1020_v26 = vpop.f32.mrf.mxu0 }
 0x123   : > { %v1063_v22 = vpop.f32.mrf.mxu1  ;;  %v1021_v31 = vadd.f32 %v1020_v26, %v483_v19  ;;  %v1062_v34 = vadd.f32 %v1061_v18, %v1019_v27  ;;  %v2081_v18 = vld [vmem:[#allocation2] sm:$0xff]  }
 0x124   : > { %1873 = vmatpush3.bf16.msra.mxu0 %v2081_v18  ;;  %v1769_v19 = vld [vmem:[%s2640_s6] ss:$0 sm:$0xff] }
 0x125   : > { %v1143_v23 = vpop.f32.mrf.mxu1  ;;  %v1064_v39 = vadd.f32 %v1063_v22, %v1021_v31 }
 0x127   : > { %v1145_v28 = vpop.f32.mrf.mxu1 }
 0x129   : > { %v1147_v37 = vpop.f32.mrf.mxu1 }
 0x12b   : > { %v1149_v46 = vpop.f32.mrf.mxu1 }
 0x15c   : > { %v1100_v29 = vpop.f32.mrf.mxu0 }
 0x15d   : > { %v1101_v36 = vadd.f32 %v1100_v29, %v1058_v32 }
 0x15e   : > { %v1102_v33 = vpop.f32.mrf.mxu0 }
 0x15f   : > { %v1103_v35 = vadd.f32 %v1102_v33, %v1060_v30  ;;  %v1144_v45 = vadd.f32 %v1143_v23, %v1101_v36 }
 0x160   : > { %v1104_v38 = vpop.f32.mrf.mxu0 }
 0x161   : > { %v1105_v40 = vadd.f32 %v1104_v38, %v1062_v34  ;;  %v1146_v42 = vadd.f32 %v1145_v28, %v1103_v35  ;;  %v1152_v51 = vmax.f32 %v1144_v45, 0.0 }
 0x162   : > { %v1106_v41 = vpop.f32.mrf.mxu0 }
 0x163   : > { %v1148_v43 = vadd.f32 %v1147_v37, %v1105_v40  ;;  %v1107_v44 = vadd.f32 %v1106_v41, %v1064_v39  ;;  %v1153_v49 = vmax.f32 %v1146_v42, 0.0 }
 0x165   : > { %v1150_v47 = vadd.f32 %v1149_v46, %v1107_v44  ;;  %v1154_v48 = vmax.f32 %v1148_v43, 0.0 }
 0x167   : > { %v1155_v50 = vmax.f32 %v1150_v47, 0.0  ;;  %v1156_v54 = vpack.c.bf16 %v1154_v48, %v1152_v51 }
 0x169   : > { %v1157_v52 = vpack.c.bf16 %v1155_v50, %v1153_v49 }
 0x16b   : > { %1325 = vmatprep.mubr.bf16.mxu1 %v1157_v52 }
 0x16c   : > { %1326 = vmatmul.mubr.bf16.vlgmr.msra.gmra.mxu1 %v1156_v54 }
 0x16d   : > { %1839 = vmatpush3.bf16.msra.mxu1 %v2066_v53  ;;  %1854 = vmatprep.mubr.msk.bf16.mxu1 %vm2125_vm1, %v2124_v8 }
 0x16e   : > { %1840 = vmatprep.subr.bf16.mxu1 %v2124_v8 }
 0x171   : > { %1841 = vmatpush3.bf16.msra.mxu1 %v2067_v55 }
 0x172   : > { %1842 = vmatprep.subr.bf16.mxu1 %v2124_v8 }
 0x175   : > { %1843 = vmatpush3.bf16.msra.mxu1 %v2068_v56 }
 0x176   : > { %1844 = vmatprep.subr.bf16.mxu1 %v2124_v8 }
 0x179   : > { %1845 = vmatpush3.bf16.msra.mxu1 %v2069_v57 }
 0x17a   : > { %1846 = vmatprep.subr.bf16.mxu1 %v2124_v8 }
 0x17d   : > { %1847 = vmatpush3.bf16.msra.mxu1 %v2070_v58 }
 0x17e   : > { %1848 = vmatprep.subr.bf16.mxu1 %v2124_v8 }
 0x181   : > { %1849 = vmatpush3.bf16.msra.mxu1 %v2071_v59 }
 0x182   : > { %1850 = vmatprep.subr.bf16.mxu1 %v2124_v8 }
 0x185   : > { %1851 = vmatpush3.bf16.msra.mxu1 %v2072_v60 }
 0x186   : > { %1852 = vmatprep.subr.bf16.mxu1 %v2124_v8  ;;  %v1778_v8 = vld [vmem:[%s2642_s8] ss:$0 sm:$0xff] }
 0x189   : > { %1853 = vmatpush3.bf16.msra.mxu1 %v2073_v61 }
 0x22c   : > { %v1814_v3 = vpop.f32.mrf.mxu1 }
 0x22e   : > { %v1815_v4 = vpop.f32.mrf.mxu1 }
 0x22f   : > { %v1816_v5 = vadd.f32 %v1815_v4, %v1814_v3 }
 0x230   : > { %v1817_v7 = vpop.f32.mrf.mxu1 }
 0x231   : > { %v1328_v10 = vadd.f32 %v1816_v5, %v1752_v6 }
 0x232   : > { %v1818_v9 = vpop.f32.mrf.mxu1 }
 0x233   : > { %v1819_v11 = vadd.f32 %v1818_v9, %v1817_v7  ;;  %v1334_v13 = vmax.f32 %v1328_v10, 0.0 }
 0x235   : > { %v1331_v12 = vadd.f32 %v1819_v11, %v1752_v6 }
 0x237   : > { %v1335_v14 = vmax.f32 %v1331_v12, 0.0 }
 0x239   : > { %v1336_v15 = vpack.c.bf16 %v1335_v14, %v1334_v13 }
 0x23b   : > { %1855 = vmatmul.mubr.bf16.vlgmr.msra.gmra.mxu1 %v1336_v15 }
 0x2fb   : > { %v1442_v20 = vpop.f32.mrf.mxu1 }
 0x2fc   : > { %v1443_v22 = vadd.f32 %v1769_v19, %v1442_v20 }
 0x2fd   : > { %v1856_v21 = vpop.f32.mrf.mxu1 }
 0x2fe   : > { %v1449_v26 = vmax.f32 %v1443_v22, 0.0 }
 0x2ff   : > { %v1445_v23 = vpop.f32.mrf.mxu1 }
 0x300   : > { %v1446_v24 = vadd.f32 %v1769_v19, %v1445_v23 }
 0x301   : > { %v1857_v25 = vpop.f32.mrf.mxu1 }
 0x302   : > { %v1450_v27 = vmax.f32 %v1446_v24, 0.0 }
 0x304   : > { %v1451_v28 = vpack.c.bf16 %v1450_v27, %v1449_v26 }
 0x306   : > { %1875 = vmatmul.mubr.bf16.vlgmr.msra.gmra.mxu0 %v1451_v28 }
 0x3c6   : > { %v1557_v29 = vpop.f32.mrf.mxu0 }
 0x3c7   : > { %v1558_v32 = vadd.f32 %v1778_v8, %v1557_v29 }
 0x3c8   : > { %v1876_v30 = vpop.f32.mrf.mxu0 }
 0x3ca   : > { %v1560_v31 = vpop.f32.mrf.mxu0 }
 0x3cb   : > { %v1561_v33 = vadd.f32 %v1778_v8, %v1560_v31 }
 0x3cc   : > { %v1877_v34 = vpop.f32.mrf.mxu0 }
 0x3cd   : > { %v1796_v35 = vpack.c.bf16 %v1561_v33, %v1558_v32 }
 0x3cf   : > { %1797 = vst [vmem:[%s352_s20] sm:$0xff] %v1796_v35  }
 0x3d0 PF: > { %s20_s30 = sadd.s32 1, %s2118_s30  }
 0x3d1   : > { %p17_p1 = scmp.ge.s32.totalorder %s20_s30, 4  }
 0x3d3   :  { %19 = sbr.rel (!%p17_p1) target bundleno = 1 (0x1), region = 91 }
 0x3d8   :  { %1596 = vsyncpa [#allocation3], 1 }
 0x3d9   :  { %1598 = vsyncpa [#allocation3 + $0x1], 1 }

</bundles_post_ra>
